<compile_context>
chip_gen: v6e
topology: v6e:2x2x1
jax: 0.10.0
libtpu: 0.0.40
codegen_flags: <defaults>
</compile_context>

<pallas_src>
import functools

import numpy as np

import jax
import jax.numpy as jnp
from jax.experimental import pallas as pl
from jax.experimental.pallas import tpu as pltpu

_LANE = 128  # lane width: padding unit for hidden (interior) feature dims


def _round_up(x, m):
    return (x + m - 1) // m * m


def _fused_mlp_kernel(*refs, num_layers):
    """Entire MLP in one kernel; activations never leave VMEM between layers.

    refs = (x_ref, w0, b0, w1, b1, ..., o_ref)
      x_ref : (B, din)                  raw (unpadded) input activations
      w_l   : (din_pad_l, dout_pad_l)   per-layer zero-padded weight, (in, out) layout
      b_l   : (1, dout_pad_l)           per-layer zero-padded bias
      o_ref : (B, dout)                 raw (unpadded) output
    """
    x_ref, o_ref = refs[0], refs[-1]
    wb = refs[1:-1]
    h = x_ref[...]
    for l in range(num_layers):          # static unroll: layer count known at trace time
        w = wb[2 * l][...]
        if w.dtype != jnp.float32:       # bf16-packed weights: upcast, accumulate in f32
            w = w.astype(jnp.float32)
        b = wb[2 * l + 1][...]           # (1, dout_pad_l) -> VPU broadcast add
        h = jnp.dot(h, w, preferred_element_type=jnp.float32) + b   # MXU matmul
        if l < num_layers - 1:
            h = jnp.maximum(h, 0.0)      # ReLU on hidden layers only
    o_ref[...] = h.astype(o_ref.dtype)


def init_params(nn_dims, key):
    """Deterministic init matching nn.Linear(nn_dims[i], nn_dims[i+1]) shapes/distribution."""
    params = []
    for i in range(len(nn_dims) - 1):
        din, dout = nn_dims[i], nn_dims[i + 1]
        key, kw, kb = jax.random.split(key, 3)
        bound = 1.0 / jnp.sqrt(din)
        # stored as (in, out) for the kernel (PyTorch keeps (out, in))
        w = jax.random.uniform(kw, (din, dout), jnp.float32, -bound, bound)
        b = jax.random.uniform(kb, (dout,), jnp.float32, -bound, bound)
        params.append((w, b))
    return params


def pack_params(params, weight_dtype=jnp.float32):
    """Per-layer zero-padded packing (done once, reused every forward).

    Hidden dims pad to a multiple of 128 lanes; layer 0 keeps its raw input dim and the
    last layer keeps its raw output dim, so the forward needs no wrapper-side pad of x nor
    slice of the output. Pass weight_dtype=jnp.bfloat16 on v6e/v7x to halve weight
    VMEM/DMA (expect ~1e-2-level relative error vs the f32 reference).
    Returns a flat list [w0, b0, w1, b1, ...].
    """
    L = len(params)
    packed = []
    for l, (w, b) in enumerate(params):
        din, dout = w.shape
        din_p = din if l == 0 else _round_up(din, _LANE)
        dout_p = dout if l == L - 1 else _round_up(dout, _LANE)
        w_p = jnp.zeros((din_p, dout_p), weight_dtype).at[:din, :dout].set(
            w.astype(weight_dtype))
        # (1, dout_p) bias; the size-1 sublane pads 1->8 in layout -- negligible here.
        b_p = jnp.zeros((1, dout_p), jnp.float32).at[0, :dout].set(b)
        packed += [w_p, b_p]
    return packed


def _vmem_limit_bytes(resident_bytes):
    """Scoped-VMEM limit sized from the actual resident slab, capped by physical VMEM."""
    try:
        physical = pltpu.get_tpu_info().vmem_capacity_bytes  # 128 MiB v5e/v6e, 64 MiB v7x
    except Exception:  # pragma: no cover - conservative fallback
        physical = 64 * 1024 * 1024
    cap = int(physical * 0.85)                 # headroom for Mosaic internal scratch
    want = 4 * resident_bytes + (2 << 20)      # prologue/epilogue DMA buffers + margin
    return max(min(want, cap), 32 * 1024 * 1024)


@jax.jit
def torch_nn_model_forward(x, packed):
    """Forward pass: ReLU(Linear) for the first L-1 layers, plain Linear at the end."""
    num_layers = len(packed) // 2
    B = x.shape[0]
    dout = packed[-2].shape[1]                 # last layer's (unpadded) output dim

    operands = (x,) + tuple(packed)
    resident_bytes = sum(int(np.prod(a.shape)) * a.dtype.itemsize for a in operands)
    resident_bytes += B * dout * 4             # output slab

    kernel = functools.partial(_fused_mlp_kernel, num_layers=num_layers)
    return pl.pallas_call(
        kernel,
        out_shape=jax.ShapeDtypeStruct((B, dout), jnp.float32),
        in_specs=[pl.BlockSpec(memory_space=pltpu.MemorySpace.VMEM)] * len(operands),
        out_specs=pl.BlockSpec(memory_space=pltpu.MemorySpace.VMEM),
        compiler_params=pltpu.CompilerParams(
            vmem_limit_bytes=_vmem_limit_bytes(resident_bytes)),
    )(*operands)


if __name__ == "__main__":
    nn_dims = [16, 32, 32, 8]          # input dim, two hidden layers, output dim
    batch = 4

    key = jax.random.PRNGKey(0)
    key, kx = jax.random.split(key)
    x = jax.random.normal(kx, (batch, nn_dims[0]), jnp.float32)
    params = init_params(nn_dims, key)

    packed = pack_params(params)       # packed once (per-layer padded), reused every call
    out = torch_nn_model_forward(x, packed)
    jax.block_until_ready(out)

    # sanity check against pure-JAX reference
    ref = x
    for i, (w, b) in enumerate(params):
        ref = ref @ w + b
        if i < len(params) - 1:
            ref = jnp.maximum(ref, 0.0)
    assert out.shape == (batch, nn_dims[-1])
    assert jnp.allclose(out, ref, atol=1e-5, rtol=1e-5)

    print("KERNEL_OK")
</pallas_src>

<mosaic_0001>
module attributes {stable_mosaic.version = 11 : i64} {
  func.func @_fused_mlp_kernel(%arg0: memref<4x16xf32, #tpu.memory_space<vmem>>, %arg1: memref<16x128xf32, #tpu.memory_space<vmem>>, %arg2: memref<1x128xf32, #tpu.memory_space<vmem>>, %arg3: memref<128x128xf32, #tpu.memory_space<vmem>>, %arg4: memref<1x128xf32, #tpu.memory_space<vmem>>, %arg5: memref<128x8xf32, #tpu.memory_space<vmem>>, %arg6: memref<1x8xf32, #tpu.memory_space<vmem>>, %arg7: memref<4x8xf32, #tpu.memory_space<vmem>>) attributes {dimension_semantics = [], scalar_prefetch = 0 : i64, scratch_operands = 0 : i64, tpu.core_type = #tpu.core_type<tc>} {
    %c0 = arith.constant 0 : index
    %c0_0 = arith.constant 0 : index
    %0 = vector.load %arg0[%c0, %c0_0] : memref<4x16xf32, #tpu.memory_space<vmem>>, vector<4x16xf32>
    %c0_1 = arith.constant 0 : index
    %c0_2 = arith.constant 0 : index
    %1 = vector.load %arg1[%c0_1, %c0_2] : memref<16x128xf32, #tpu.memory_space<vmem>>, vector<16x128xf32>
    %c0_3 = arith.constant 0 : index
    %c0_4 = arith.constant 0 : index
    %2 = vector.load %arg2[%c0_3, %c0_4] : memref<1x128xf32, #tpu.memory_space<vmem>>, vector<1x128xf32>
    %cst = arith.constant dense<0.000000e+00> : vector<4x128xf32>
    %3 = tpu.matmul %0, %1, %cst {dimension_numbers = #tpu.dot_dimension_numbers<[1], [0], [0], [1], [0, 0, 1, 1], [], []>} : vector<4x16xf32>, vector<16x128xf32>, vector<4x128xf32> -> vector<4x128xf32>
    %4 = vector.broadcast %2 : vector<1x128xf32> to vector<4x128xf32>
    %5 = arith.addf %3, %4 : vector<4x128xf32>
    %cst_5 = arith.constant 0.000000e+00 : f32
    %6 = vector.broadcast %cst_5 : f32 to vector<4x128xf32>
    %7 = arith.maximumf %5, %6 : vector<4x128xf32>
    %c0_6 = arith.constant 0 : index
    %c0_7 = arith.constant 0 : index
    %8 = vector.load %arg3[%c0_6, %c0_7] : memref<128x128xf32, #tpu.memory_space<vmem>>, vector<128x128xf32>
    %c0_8 = arith.constant 0 : index
    %c0_9 = arith.constant 0 : index
    %9 = vector.load %arg4[%c0_8, %c0_9] : memref<1x128xf32, #tpu.memory_space<vmem>>, vector<1x128xf32>
    %cst_10 = arith.constant dense<0.000000e+00> : vector<4x128xf32>
    %10 = tpu.matmul %7, %8, %cst_10 {dimension_numbers = #tpu.dot_dimension_numbers<[1], [0], [0], [1], [0, 0, 1, 1], [], []>} : vector<4x128xf32>, vector<128x128xf32>, vector<4x128xf32> -> vector<4x128xf32>
    %11 = vector.broadcast %9 : vector<1x128xf32> to vector<4x128xf32>
    %12 = arith.addf %10, %11 : vector<4x128xf32>
    %cst_11 = arith.constant 0.000000e+00 : f32
    %13 = vector.broadcast %cst_11 : f32 to vector<4x128xf32>
    %14 = arith.maximumf %12, %13 : vector<4x128xf32>
    %c0_12 = arith.constant 0 : index
    %c0_13 = arith.constant 0 : index
    %15 = vector.load %arg5[%c0_12, %c0_13] : memref<128x8xf32, #tpu.memory_space<vmem>>, vector<128x8xf32>
    %c0_14 = arith.constant 0 : index
    %c0_15 = arith.constant 0 : index
    %16 = vector.load %arg6[%c0_14, %c0_15] : memref<1x8xf32, #tpu.memory_space<vmem>>, vector<1x8xf32>
    %cst_16 = arith.constant dense<0.000000e+00> : vector<4x8xf32>
    %17 = tpu.matmul %14, %15, %cst_16 {dimension_numbers = #tpu.dot_dimension_numbers<[1], [0], [0], [1], [0, 0, 1, 1], [], []>} : vector<4x128xf32>, vector<128x8xf32>, vector<4x8xf32> -> vector<4x8xf32>
    %18 = vector.broadcast %16 : vector<1x8xf32> to vector<4x8xf32>
    %19 = arith.addf %17, %18 : vector<4x8xf32>
    %c0_17 = arith.constant 0 : index
    %c0_18 = arith.constant 0 : index
    %20 = vector.load %arg7[%c0_17, %c0_18] : memref<4x8xf32, #tpu.memory_space<vmem>>, vector<4x8xf32>
    tpu.vector_store %arg7[%c0_17, %c0_18], %19 {strides = array<i32>} : memref<4x8xf32, #tpu.memory_space<vmem>>, vector<4x8xf32>,
    return
  }
}

</mosaic_0001>

<bundles_post_ra>
// kernel: torch_nn_model_forward.1
= control target key start
LH: loop header
LB: loop body
LE: loop exit
PB: predicated region body
PF: predicated region fallthrough
CT: control target
= control target key end

     0   :  { %12 = vsyncpa [#allocation3], 0  ;;  %s698_s0 = inlined_call_operand.vmem [shape: f32[4,16], index: 0, kind: input, shape index: {}]   ;;  %s699_s1 = inlined_call_operand.hbm [shape: f32[16,128], index: 1, kind: input, shape index: {}]   ;;  %s700_s2 = inlined_call_operand.vmem [shape: f32[1,128], index: 2, kind: input, shape index: {}]   ;;  %s701_s3 = inlined_call_operand.vmem [shape: f32[128,128], index: 3, kind: input, shape index: {}]   ;;  %s702_s4 = inlined_call_operand.vmem [shape: f32[1,128], index: 4, kind: input, shape index: {}]   ;;  %s703_s5 = inlined_call_operand.vmem [shape: f32[128,8], index: 5, kind: input, shape index: {}]   ;;  %s704_s6 = inlined_call_operand.vmem [shape: f32[1,8], index: 6, kind: input, shape index: {}]   ;;  %s705_s7 = inlined_call_operand.hbm [shape: f32[4,8], index: 7, kind: output, shape index: {}]  }
   0x1   :  { %13 = vsyncpa [#allocation4], 0  ;;  %s498_s24 = smov [#allocation2]  }
   0x2   :  { %s21_s25 = sshll.u32 %s498_s24, 4  ;;  %s22_s25 = int_to_ptr.vmem [resolvable:$true] %s21_s25 }
   0x3   :  { %s462_s26 = scalar_lea.vmem %s22_s25, 256  ;;  %p467_p1 = scmp.lt.s32.totalorder %s22_s25, %s22_s25 }
   0x4   :  { %p463_p0 = scmp.ne.s32.totalorder %s22_s25, %s462_s26  ;;  %p468_p2 = scmp.lt.s32.totalorder %s462_s26, %s462_s26 }
   0x6   :  { %p469_p3 = por %p468_p2, %p467_p1 }
   0x8   :  { %p470_p4 = pnand %p469_p3, %p463_p0 }
   0xa   :  { %473 = shalt.err (!%p470_p4)
}
   0xb   :  { %s499_s27 = smov 128   ;;  %s500_s28 = smov 8  }
   0xc   :  { %27 = dma.hbm_to_vmem [thread:$0]  %s699_s1, 256, %s22_s25, [#allocation3], %s499_s27, %s499_s27, %s500_s28  }
   0xd   :  { %494 = dma.done.wait [#allocation3], 256  }
   0xe   :  { %495 = vsyncadd [#allocation3], 4294967040  ;;  %v501_v0 = vmov 0.0   ;;  %vm502_vm0 = vmmov 0   ;;  %v43_v1 = vld [vmem:[#allocation2 + $0x8] sm:$0xff]  ;;  %v42_v2 = vld [vmem:[#allocation2] sm:$0xff] }
   0xf   :  { %371 = vmatprep.subr.mxu0 %v501_v0  ;;  %375 = vmatprep.mubr.msk.f32.mxu0 %vm502_vm0, %v501_v0  ;;  %v41_v3 = vld [vmem:[%s698_s0] sm:$0xf]  ;;  %vm51_vm1 = vcmask 130048   ;;  %v141_v4 = vld [vmem:[%s701_s3 + $0x78] sm:$0xff]  ;;  %v140_v5 = vld [vmem:[%s701_s3 + $0x70] sm:$0xff]  ;;  %s503_s25 = smov [#allocation5]  }
  0x10   :  { %378 = vmatprep.subr.mxu1 %v501_v0  ;;  %410 = vmatprep.mubr.msk.f32.mxu1 %vm502_vm0, %v501_v0  ;;  %v139_v6 = vld [vmem:[%s701_s3 + $0x68] sm:$0xff]  ;;  %v138_v7 = vld [vmem:[%s701_s3 + $0x60] sm:$0xff]  ;;  %v137_v8 = vld [vmem:[%s701_s3 + $0x58] sm:$0xff]  ;;  %s321_s26 = sshll.u32 %s503_s25, 4  ;;  %vm313_vm2 = vcmask 60416   ;;  %s322_s26 = int_to_ptr.vmem [resolvable:$true] %s321_s26 }
  0x11   :  { %372 = vmatpush3.msra.mxu0 %v43_v1  ;;  %379 = vmatpush3.msra.mxu1 %v141_v4  ;;  %v136_v9 = vld [vmem:[%s701_s3 + $0x50] sm:$0xff]  ;;  %v135_v10 = vld [vmem:[%s701_s3 + $0x48] sm:$0xff]  ;;  %v134_v11 = vld [vmem:[%s701_s3 + $0x40] sm:$0xff]  ;;  %p479_p6 = scmp.lt.s32.totalorder %s322_s26, %s322_s26 }
  0x12   :  { %373 = vmatprep.subr.mxu0 %v501_v0  ;;  %380 = vmatprep.subr.mxu1 %v501_v0  ;;  %v133_v12 = vld [vmem:[%s701_s3 + $0x38] sm:$0xff]  ;;  %v132_v13 = vld [vmem:[%s701_s3 + $0x30] sm:$0xff]  ;;  %v131_v14 = vld [vmem:[%s701_s3 + $0x28] sm:$0xff] }
  0x13   :  { %374 = vmatpush3.msra.mxu0 %v42_v2  ;;  %381 = vmatpush3.msra.mxu1 %v140_v5  ;;  %v130_v15 = vld [vmem:[%s701_s3 + $0x20] sm:$0xff]  ;;  %v129_v16 = vld [vmem:[%s701_s3 + $0x18] sm:$0xff]  ;;  %v128_v17 = vld [vmem:[%s701_s3 + $0x10] sm:$0xff] }
  0x14   :  { %376 = vmatmul.mubr.msk.f32.vlgmr.msra.gmra.mxu0 %vm51_vm1, %v41_v3  ;;  %382 = vmatprep.subr.mxu1 %v501_v0  ;;  %v127_v18 = vld [vmem:[%s701_s3 + $0x8] sm:$0xff]  ;;  %v126_v19 = vld [vmem:[%s701_s3] sm:$0xff]  ;;  %v235_v20 = vld [vmem:[%s703_s5 + $0x78] sm:$0xff] }
  0x15   :  { %413 = vmatprep.subr.mxu0 %v501_v0  ;;  %383 = vmatpush3.msra.mxu1 %v139_v6  ;;  %v234_v21 = vld [vmem:[%s703_s5 + $0x70] sm:$0xff]  ;;  %v233_v22 = vld [vmem:[%s703_s5 + $0x68] sm:$0xff]  ;;  %v232_v23 = vld [vmem:[%s703_s5 + $0x60] sm:$0xff] }
  0x16   :  { %445 = vmatprep.mubr.msk.f32.mxu0 %vm502_vm0, %v501_v0  ;;  %384 = vmatprep.subr.mxu1 %v501_v0  ;;  %v231_v24 = vld [vmem:[%s703_s5 + $0x58] sm:$0xff]  ;;  %v230_v25 = vld [vmem:[%s703_s5 + $0x50] sm:$0xff]  ;;  %v229_v26 = vld [vmem:[%s703_s5 + $0x48] sm:$0xff] }
  0x17   :  { %385 = vmatpush3.msra.mxu1 %v138_v7  ;;  %414 = vmatpush3.msra.mxu0 %v235_v20  ;;  %v228_v27 = vld [vmem:[%s703_s5 + $0x40] sm:$0xff]  ;;  %v227_v28 = vld [vmem:[%s703_s5 + $0x38] sm:$0xff]  ;;  %v226_v29 = vld [vmem:[%s703_s5 + $0x30] sm:$0xff] }
  0x18   :  { %386 = vmatprep.subr.mxu1 %v501_v0  ;;  %415 = vmatprep.subr.mxu0 %v501_v0  ;;  %v225_v30 = vld [vmem:[%s703_s5 + $0x28] sm:$0xff]  ;;  %v224_v31 = vld [vmem:[%s703_s5 + $0x20] sm:$0xff]  ;;  %v223_v32 = vld [vmem:[%s703_s5 + $0x18] sm:$0xff] }
  0x19   :  { %387 = vmatpush3.msra.mxu1 %v137_v8  ;;  %416 = vmatpush3.msra.mxu0 %v234_v21  ;;  %v330_v33 = vld [vmem:[%s700_s2] ss:$0 sm:$0xff]  ;;  %v222_v38 = vld [vmem:[%s703_s5 + $0x10] sm:$0xff]  ;;  %v221_v39 = vld [vmem:[%s703_s5 + $0x8] sm:$0xff] }
  0x1a   :  { %388 = vmatprep.subr.mxu1 %v501_v0  ;;  %417 = vmatprep.subr.mxu0 %v501_v0  ;;  %v220_v40 = vld [vmem:[%s703_s5] sm:$0xff]  ;;  %s474_s5 = scalar_lea.vmem %s322_s26, 64 }
  0x1b   :  { %389 = vmatpush3.msra.mxu1 %v136_v9  ;;  %418 = vmatpush3.msra.mxu0 %v233_v22  ;;  %v332_v41 = vld [vmem:[%s702_s4] ss:$0 sm:$0xff]  ;;  %p475_p5 = scmp.ne.s32.totalorder %s322_s26, %s474_s5  ;;  %p480_p7 = scmp.lt.s32.totalorder %s474_s5, %s474_s5 }
  0x1c   :  { %390 = vmatprep.subr.mxu1 %v501_v0  ;;  %419 = vmatprep.subr.mxu0 %v501_v0  ;;  %v333_v46 = vld [vmem:[%s704_s6] ss:$0 sm:$0xff] }
  0x1d   :  { %391 = vmatpush3.msra.mxu1 %v135_v10  ;;  %420 = vmatpush3.msra.mxu0 %v232_v23  ;;  %p481_p8 = por %p480_p7, %p479_p6 }
  0x1e   :  { %392 = vmatprep.subr.mxu1 %v501_v0  ;;  %421 = vmatprep.subr.mxu0 %v501_v0 }
  0x1f   :  { %393 = vmatpush3.msra.mxu1 %v134_v11  ;;  %422 = vmatpush3.msra.mxu0 %v231_v24  ;;  %p482_p9 = pnand %p481_p8, %p475_p5 }
  0x20   :  { %394 = vmatprep.subr.mxu1 %v501_v0  ;;  %423 = vmatprep.subr.mxu0 %v501_v0 }
  0x21   :  { %395 = vmatpush3.msra.mxu1 %v133_v12  ;;  %424 = vmatpush3.msra.mxu0 %v230_v25 }
  0x22   :  { %396 = vmatprep.subr.mxu1 %v501_v0  ;;  %425 = vmatprep.subr.mxu0 %v501_v0 }
  0x23   :  { %397 = vmatpush3.msra.mxu1 %v132_v13  ;;  %426 = vmatpush3.msra.mxu0 %v229_v26 }
  0x24   :  { %398 = vmatprep.subr.mxu1 %v501_v0  ;;  %427 = vmatprep.subr.mxu0 %v501_v0 }
  0x25   :  { %399 = vmatpush3.msra.mxu1 %v131_v14  ;;  %428 = vmatpush3.msra.mxu0 %v228_v27 }
  0x26   :  { %400 = vmatprep.subr.mxu1 %v501_v0  ;;  %429 = vmatprep.subr.mxu0 %v501_v0 }
  0x27   :  { %401 = vmatpush3.msra.mxu1 %v130_v15  ;;  %430 = vmatpush3.msra.mxu0 %v227_v28 }
  0x28   :  { %402 = vmatprep.subr.mxu1 %v501_v0  ;;  %431 = vmatprep.subr.mxu0 %v501_v0 }
  0x29   :  { %403 = vmatpush3.msra.mxu1 %v129_v16  ;;  %432 = vmatpush3.msra.mxu0 %v226_v29 }
  0x2a   :  { %404 = vmatprep.subr.mxu1 %v501_v0  ;;  %433 = vmatprep.subr.mxu0 %v501_v0 }
  0x2b   :  { %405 = vmatpush3.msra.mxu1 %v128_v17  ;;  %434 = vmatpush3.msra.mxu0 %v225_v30 }
  0x2c   :  { %406 = vmatprep.subr.mxu1 %v501_v0  ;;  %435 = vmatprep.subr.mxu0 %v501_v0 }
  0x2d   :  { %407 = vmatpush3.msra.mxu1 %v127_v18  ;;  %436 = vmatpush3.msra.mxu0 %v224_v31 }
  0x2e   :  { %408 = vmatprep.subr.mxu1 %v501_v0  ;;  %437 = vmatprep.subr.mxu0 %v501_v0 }
  0x2f   :  { %409 = vmatpush3.msra.mxu1 %v126_v19  ;;  %438 = vmatpush3.msra.mxu0 %v223_v32 }
  0x30   :  { %439 = vmatprep.subr.mxu0 %v501_v0 }
  0x31   :  { %440 = vmatpush3.msra.mxu0 %v222_v38 }
  0x32   :  { %441 = vmatprep.subr.mxu0 %v501_v0 }
  0x33   :  { %442 = vmatpush3.msra.mxu0 %v221_v39 }
  0x34   :  { %443 = vmatprep.subr.mxu0 %v501_v0 }
  0x35   :  { %444 = vmatpush3.msra.mxu0 %v220_v40 }
  0xd4   :  { %v121_v34 = vpop.f32.mrf.mxu0 }
  0xd5   :  { %v122_v35 = vadd.f32 %v330_v33, %v121_v34 }
  0xd6   :  { %v377_v36 = vpop.f32.mrf.mxu0 }
  0xd7   :  { %v125_v37 = vmax.f32 %v122_v35, 0.0 }
  0xd9   :  { %411 = vmatmul.mubr.f32.vlgmr.msra.gmra.mxu1 %v125_v37 }
 0x199   :  { %v215_v42 = vpop.f32.mrf.mxu1 }
 0x19a   :  { %v216_v43 = vadd.f32 %v332_v41, %v215_v42 }
 0x19b   :  { %v412_v44 = vpop.f32.mrf.mxu1 }
 0x19c   :  { %v219_v45 = vmax.f32 %v216_v43, 0.0 }
 0x19e   :  { %446 = vmatmul.mubr.f32.vlgmr.msra.gmra.mxu0 %v219_v45 }
 0x25e   :  { %v309_v47 = vpop.f32.mrf.mxu0 }
 0x25f   :  { %v310_v48 = vadd.f32 %v333_v46, %v309_v47 }
 0x260   :  { %v447_v49 = vpop.f32.mrf.mxu0 }
 0x261   :  { %314 = vst.msk [vmem:[#allocation5] sm:$0xf] %vm313_vm2, %v310_v48 }
 0x262   :  { %485 = shalt.err (!%p482_p9)
}
 0x263   :  { %324 = dma.vmem_to_hbm [thread:$0]  %s322_s26, 64, %s705_s7, [#allocation4]  }
 0x264   :  { %496 = dma.done.wait [#allocation4], 64  }
 0x265   :  { %497 = vsyncadd [#allocation4], 4294967232 }
 0x266   :  { %328 = vsyncpa [#allocation3], 1 }
 0x267   :  { %329 = vsyncpa [#allocation4], 1 }

</bundles_post_ra>
